<compile_context>
chip_gen: v7x
topology: tpu7x:2x2x1
jax: 0.10.0
libtpu: 0.0.40
codegen_flags: <defaults>
</compile_context>

<pallas_src>
import functools

import jax
import jax.numpy as jnp
from jax.experimental import pallas as pl
from jax.experimental.pallas import tpu as pltpu

OBSERVATION_SPACE_SIZE = 4
ACTION_SPACE_SIZE = 2
H1 = 150
H2 = 120

# Hardware-padded (lane-dense) sizes.  One extra input column carries the
# constant 1 that feeds the folded bias rows.
IN_P = 8      # 4 real + 1 bias-carrier -> 8
H1_P = 256    # 150 real + carrier at column 150 -> 256
H2_P = 128    # 120 real + carrier at column 120 -> 128
OUT_P = 128   # 2 real logits -> 128 lane-dense output tile (slice outside)


def _round_up(n, m):
    return ((n + m - 1) // m) * m


def _mlp_kernel(x_ref, w1_ref, w2_ref, w3_ref, o_ref):
    # x tile: (TB, 8) bf16.  Weights bf16 (biases folded in), accumulation f32.
    h1 = jnp.maximum(
        jnp.dot(x_ref[...], w1_ref[...], preferred_element_type=jnp.float32),
        0.0)
    h2 = jnp.maximum(
        jnp.dot(h1.astype(jnp.bfloat16), w2_ref[...],
                preferred_element_type=jnp.float32),
        0.0)
    y = jnp.dot(h2.astype(jnp.bfloat16), w3_ref[...],
                preferred_element_type=jnp.float32)
    # bf16 store: halves output HBM bytes / vst work vs f32.
    o_ref[...] = y.astype(o_ref.dtype)


def init_params(key):
    """Deterministic init mimicking nn.Linear's U(-1/sqrt(fan_in), 1/sqrt(fan_in)).

    Stored unpadded, (in, out) layout, f32 — these define the module semantics.
    """
    def linear(key, fan_in, fan_out):
        kw, kb = jax.random.split(key)
        bound = 1.0 / jnp.sqrt(jnp.float32(fan_in))
        w = jax.random.uniform(kw, (fan_in, fan_out), jnp.float32, -bound, bound)
        b = jax.random.uniform(kb, (fan_out,), jnp.float32, -bound, bound)
        return w, b

    k1, k2, k3 = jax.random.split(key, 3)
    w1, b1 = linear(k1, OBSERVATION_SPACE_SIZE, H1)
    w2, b2 = linear(k2, H1, H2)
    w3, b3 = linear(k3, H2, ACTION_SPACE_SIZE)
    return (w1, b1, w2, b2, w3, b3)


def pack_params(params):
    """Zero-pad to hardware shapes and fold biases into the weight matrices.

    Layout (all bf16):
      W1[:4,  :150] = w1      W1[4,   :150] = b1      W1[4,   150] = 1.0
      W2[:150,:120] = w2      W2[150, :120] = b2      W2[150, 120] = 1.0
      W3[:120,:2]   = w3      W3[120, :2]   = b3
    The constant-1 input column (x_p[:, 4]) feeds W1's bias row; the 1.0
    "carrier" entries keep a column of exact ones flowing through the ReLUs
    so each subsequent bias row also applies.  All other padded entries are
    exactly zero, which is transparent through matmul + ReLU.
    """
    w1, b1, w2, b2, w3, b3 = params

    W1 = jnp.zeros((IN_P, H1_P), jnp.float32)
    W1 = W1.at[:OBSERVATION_SPACE_SIZE, :H1].set(w1)
    W1 = W1.at[OBSERVATION_SPACE_SIZE, :H1].set(b1)
    W1 = W1.at[OBSERVATION_SPACE_SIZE, H1].set(1.0)       # carrier -> h1[:,150]=1

    W2 = jnp.zeros((H1_P, H2_P), jnp.float32)
    W2 = W2.at[:H1, :H2].set(w2)
    W2 = W2.at[H1, :H2].set(b2)
    W2 = W2.at[H1, H2].set(1.0)                           # carrier -> h2[:,120]=1

    W3 = jnp.zeros((H2_P, OUT_P), jnp.float32)
    W3 = W3.at[:H2, :ACTION_SPACE_SIZE].set(w3)
    W3 = W3.at[H2, :ACTION_SPACE_SIZE].set(b3)

    return (W1.astype(jnp.bfloat16),
            W2.astype(jnp.bfloat16),
            W3.astype(jnp.bfloat16))


@functools.partial(jax.jit, static_argnames=("block_b",))
def dqn_dummy_forward_pallas(x, packed_params, *, block_b=2048):
    """x: (B, 4) float32 -> (B, 2) float32.  packed_params from pack_params()."""
    w1, w2, w3 = packed_params
    B = x.shape[0]

    # Batch tile: multiple of 16 sublanes (bf16 packing).  Cap at ceil(B/2) so
    # moderate batches produce >= 2 grid steps (lets v7x's two TensorCores
    # split the "parallel" axis); cap at block_b so big batches pipeline.
    TB = min(block_b, max(16, _round_up(-(-B // 2), 16)))
    B_pad = _round_up(B, TB)

    # Append the constant-1 bias-carrier column, zero-pad batch + feature dims,
    # cast once to bf16 (MXU input).  Padded rows see carrier 0 -> outputs 0,
    # and are sliced away below.
    x_aug = jnp.concatenate([x, jnp.ones((B, 1), x.dtype)], axis=1)   # (B, 5)
    x_p = jnp.pad(
        x_aug,
        ((0, B_pad - B), (0, IN_P - (OBSERVATION_SPACE_SIZE + 1))),
    ).astype(jnp.bfloat16)

    const = lambda shape: pl.BlockSpec(shape, lambda i: (0, 0))

    out_padded = pl.pallas_call(
        _mlp_kernel,
        out_shape=jax.ShapeDtypeStruct((B_pad, OUT_P), jnp.bfloat16),
        grid=(B_pad // TB,),
        in_specs=[
            pl.BlockSpec((TB, IN_P), lambda i: (i, 0)),   # x: tiled over batch
            const((IN_P, H1_P)),                          # weights: same block
            const((H1_P, H2_P)),                          # every step -> stay
            const((H2_P, OUT_P)),                         # VMEM-resident
        ],
        out_specs=pl.BlockSpec((TB, OUT_P), lambda i: (i, 0)),
        compiler_params=pltpu.CompilerParams(
            dimension_semantics=("parallel",),            # 2 TCs on v7x
            vmem_limit_bytes=32 * 1024 * 1024,            # v5e headroom at big TB
        ),
    )(x_p, w1, w2, w3)

    # Lane-dense bf16 kernel output; real logits are the first 2 lanes.
    return out_padded[:B, :ACTION_SPACE_SIZE].astype(jnp.float32)


def dqn_dummy_forward(x, packed_params, *, block_b=2048, min_pallas_batch=128):
    """Dispatcher: for tiny batches (single-step RL inference) the fixed
    pallas_call / grid-step overhead dominates ~1 us of math, so use plain XLA
    with the same packed (bias-folded) weights; otherwise run the kernel."""
    if x.shape[0] < min_pallas_batch:
        w1, w2, w3 = packed_params
        xa = jnp.concatenate([x, jnp.ones((x.shape[0], 1), x.dtype)], axis=1)
        xa = jnp.pad(xa, ((0, 0), (0, IN_P - xa.shape[1]))).astype(jnp.bfloat16)
        h1 = jnp.maximum(jnp.dot(xa, w1, preferred_element_type=jnp.float32), 0.0)
        h2 = jnp.maximum(jnp.dot(h1.astype(jnp.bfloat16), w2,
                                 preferred_element_type=jnp.float32), 0.0)
        y = jnp.dot(h2.astype(jnp.bfloat16), w3,
                    preferred_element_type=jnp.float32)
        return y[:, :ACTION_SPACE_SIZE]
    return dqn_dummy_forward_pallas(x, packed_params, block_b=block_b)


def reference_forward(x, params):
    w1, b1, w2, b2, w3, b3 = params
    h1 = jnp.maximum(x @ w1 + b1, 0.0)
    h2 = jnp.maximum(h1 @ w2 + b2, 0.0)
    return h2 @ w3 + b3


if __name__ == "__main__":
    key = jax.random.PRNGKey(0)
    k_params, k_x = jax.random.split(key)

    params = init_params(k_params)
    packed = pack_params(params)

    # batch=8: single grid step.  batch=200: exercises grid=2 + batch-tail
    # padding on the tiled path.
    for batch in (8, 200):
        x = jax.random.normal(jax.random.fold_in(k_x, batch),
                              (batch, OBSERVATION_SPACE_SIZE), jnp.float32)

        y = dqn_dummy_forward_pallas(x, packed)
        jax.block_until_ready(y)

        y_ref = reference_forward(x, params)
        assert y.shape == (batch, ACTION_SPACE_SIZE)
        # bf16 weights/activations/output on the MXU path -> relaxed tolerance
        # vs the f32 reference.
        assert jnp.allclose(y, y_ref, atol=5e-2, rtol=5e-2), (
            f"batch={batch}: max abs err {jnp.max(jnp.abs(y - y_ref))}")

    print("KERNEL_OK")
</pallas_src>

<mosaic_0001>
module attributes {stable_mosaic.version = 11 : i64} {
  func.func @_mlp_kernel(%arg0: i32, %arg1: memref<16x8xbf16, #tpu.memory_space<vmem>>, %arg2: memref<8x256xbf16, #tpu.memory_space<vmem>>, %arg3: memref<256x128xbf16, #tpu.memory_space<vmem>>, %arg4: memref<128x128xbf16, #tpu.memory_space<vmem>>, %arg5: memref<16x128xbf16, #tpu.memory_space<vmem>>) attributes {dimension_semantics = [#tpu.dimension_semantics<parallel>], iteration_bounds = array<i64: 1>, scalar_prefetch = 0 : i64, scratch_operands = 0 : i64, tpu.core_type = #tpu.core_type<tc>, window_params = [{transform_indices = @transform_0, window_bounds = array<i64: 16, 8>}, {pipeline_mode = #tpu.pipeline_mode<synchronous>, transform_indices = @transform_1, window_bounds = array<i64: 8, 256>}, {pipeline_mode = #tpu.pipeline_mode<synchronous>, transform_indices = @transform_2, window_bounds = array<i64: 256, 128>}, {pipeline_mode = #tpu.pipeline_mode<synchronous>, transform_indices = @transform_3, window_bounds = array<i64: 128, 128>}, {transform_indices = @transform_4, window_bounds = array<i64: 16, 128>}]} {
    %c0 = arith.constant 0 : index
    %c0_0 = arith.constant 0 : index
    %0 = vector.load %arg1[%c0, %c0_0] : memref<16x8xbf16, #tpu.memory_space<vmem>>, vector<16x8xbf16>
    %c0_1 = arith.constant 0 : index
    %c0_2 = arith.constant 0 : index
    %1 = vector.load %arg2[%c0_1, %c0_2] : memref<8x256xbf16, #tpu.memory_space<vmem>>, vector<8x256xbf16>
    %cst = arith.constant dense<0.000000e+00> : vector<16x256xf32>
    %2 = tpu.matmul %0, %1, %cst {dimension_numbers = #tpu.dot_dimension_numbers<[1], [0], [0], [1], [0, 0, 1, 1], [], []>} : vector<16x8xbf16>, vector<8x256xbf16>, vector<16x256xf32> -> vector<16x256xf32>
    %cst_3 = arith.constant 0.000000e+00 : f32
    %3 = vector.broadcast %cst_3 : f32 to vector<16x256xf32>
    %4 = arith.maximumf %2, %3 : vector<16x256xf32>
    %5 = arith.truncf %4 : vector<16x256xf32> to vector<16x256xbf16>
    %c0_4 = arith.constant 0 : index
    %c0_5 = arith.constant 0 : index
    %6 = vector.load %arg3[%c0_4, %c0_5] : memref<256x128xbf16, #tpu.memory_space<vmem>>, vector<256x128xbf16>
    %cst_6 = arith.constant dense<0.000000e+00> : vector<16x128xf32>
    %7 = tpu.matmul %5, %6, %cst_6 {dimension_numbers = #tpu.dot_dimension_numbers<[1], [0], [0], [1], [0, 0, 1, 1], [], []>} : vector<16x256xbf16>, vector<256x128xbf16>, vector<16x128xf32> -> vector<16x128xf32>
    %cst_7 = arith.constant 0.000000e+00 : f32
    %8 = vector.broadcast %cst_7 : f32 to vector<16x128xf32>
    %9 = arith.maximumf %7, %8 : vector<16x128xf32>
    %10 = arith.truncf %9 : vector<16x128xf32> to vector<16x128xbf16>
    %c0_8 = arith.constant 0 : index
    %c0_9 = arith.constant 0 : index
    %11 = vector.load %arg4[%c0_8, %c0_9] : memref<128x128xbf16, #tpu.memory_space<vmem>>, vector<128x128xbf16>
    %cst_10 = arith.constant dense<0.000000e+00> : vector<16x128xf32>
    %12 = tpu.matmul %10, %11, %cst_10 {dimension_numbers = #tpu.dot_dimension_numbers<[1], [0], [0], [1], [0, 0, 1, 1], [], []>} : vector<16x128xbf16>, vector<128x128xbf16>, vector<16x128xf32> -> vector<16x128xf32>
    %13 = arith.truncf %12 : vector<16x128xf32> to vector<16x128xbf16>
    %c0_11 = arith.constant 0 : index
    %c0_12 = arith.constant 0 : index
    %14 = vector.load %arg5[%c0_11, %c0_12] : memref<16x128xbf16, #tpu.memory_space<vmem>>, vector<16x128xbf16>
    tpu.vector_store %arg5[%c0_11, %c0_12], %13 {strides = array<i32>} : memref<16x128xbf16, #tpu.memory_space<vmem>>, vector<16x128xbf16>,
    return
  }
  func.func @transform_0(%arg0: i32) -> (i32, i32) {
    %c0_i32 = arith.constant 0 : i32
    %c0_i32_0 = arith.constant 0 : i32
    return %arg0, %c0_i32 : i32, i32
  }
  func.func @transform_1(%arg0: i32) -> (i32, i32) {
    %c0_i32 = arith.constant 0 : i32
    %c0_i32_0 = arith.constant 0 : i32
    %c0_i32_1 = arith.constant 0 : i32
    return %c0_i32, %c0_i32_0 : i32, i32
  }
  func.func @transform_2(%arg0: i32) -> (i32, i32) {
    %c0_i32 = arith.constant 0 : i32
    %c0_i32_0 = arith.constant 0 : i32
    %c0_i32_1 = arith.constant 0 : i32
    return %c0_i32, %c0_i32_0 : i32, i32
  }
  func.func @transform_3(%arg0: i32) -> (i32, i32) {
    %c0_i32 = arith.constant 0 : i32
    %c0_i32_0 = arith.constant 0 : i32
    %c0_i32_1 = arith.constant 0 : i32
    return %c0_i32, %c0_i32_0 : i32, i32
  }
  func.func @transform_4(%arg0: i32) -> (i32, i32) {
    %c0_i32 = arith.constant 0 : i32
    %c0_i32_0 = arith.constant 0 : i32
    return %arg0, %c0_i32 : i32, i32
  }
}

</mosaic_0001>

<bundles_post_ra>
// kernel: dqn_dummy_forward_pallas.1
= control target key start
LH: loop header
LB: loop body
LE: loop exit
PB: predicated region body
PF: predicated region fallthrough
CT: control target
= control target key end

     0   :  { %9 = vsyncpa [#allocation3], 0  ;;  %s648_s0 = inlined_call_operand.vmem [shape: bf16[16,8], index: 0, kind: input, shape index: {}]   ;;  %s649_s1 = inlined_call_operand.vmem [shape: bf16[8,256], index: 1, kind: input, shape index: {}]   ;;  %s650_s2 = inlined_call_operand.hbm [shape: bf16[256,128], index: 2, kind: input, shape index: {}]   ;;  %s651_s3 = inlined_call_operand.hbm [shape: bf16[128,128], index: 3, kind: input, shape index: {}]   ;;  %s652_s4 = inlined_call_operand.vmem [shape: bf16[16,128], index: 4, kind: output, shape index: {}]  }
   0x1   :  { %10 = vsyncpa [#allocation5], 0  ;;  %s583_s15 = smov [#allocation2]   ;;  %s535_s19 = scalar_lea.hbm %s650_s2, 2048 }
   0x2   :  { %s20_s16 = sshll.u32 %s583_s15, 4  ;;  %p536_p0 = scmp.ne.s32.totalorder %s650_s2, %s535_s19  ;;  %s21_s16 = int_to_ptr.vmem [resolvable:$true] %s20_s16 }
   0x3   :  { %p539_p1 = scmp.lt.u32.totalorder %s535_s19, %s650_s2 }
   0x5   :  { %p541_p2 = pnand %p539_p1, %p536_p0 }
   0x7   :  { %544 = shalt.err (!%p541_p2)
}
   0x8   :  { %s545_s24 = scalar_lea.vmem %s21_s16, 2048  ;;  %p550_p4 = scmp.lt.s32.totalorder %s21_s16, %s21_s16 }
   0x9   :  { %p546_p3 = scmp.ne.s32.totalorder %s21_s16, %s545_s24  ;;  %p551_p5 = scmp.lt.s32.totalorder %s545_s24, %s545_s24 }
   0xb   :  { %p552_p6 = por %p551_p5, %p550_p4 }
   0xd   :  { %p553_p7 = pnand %p552_p6, %p546_p3 }
   0xf   :  { %556 = shalt.err (!%p553_p7)
}
  0x10   :  { %s584_s25 = smov 64   ;;  %s585_s26 = smov 4  }
  0x11   :  { %26 = dma.hbm_to_vmem [thread:$0]  %s650_s2, 2048, %s21_s16, [#allocation3], %s584_s25, %s584_s25, %s585_s26  }
  0x12   :  { %s586_s29 = smov [#allocation4]   ;;  %s557_s7 = scalar_lea.hbm %s651_s3, 1024 }
  0x13   :  { %s32_s30 = sshll.u32 %s586_s29, 4  ;;  %p558_p8 = scmp.ne.s32.totalorder %s651_s3, %s557_s7  ;;  %s33_s30 = int_to_ptr.vmem [resolvable:$true] %s32_s30 }
  0x14   :  { %p561_p9 = scmp.lt.u32.totalorder %s557_s7, %s651_s3 }
  0x16   :  { %p563_p10 = pnand %p561_p9, %p558_p8 }
  0x18   :  { %566 = shalt.err (!%p563_p10)
}
  0x19   :  { %s567_s12 = scalar_lea.vmem %s33_s30, 1024  ;;  %p572_p12 = scmp.lt.s32.totalorder %s33_s30, %s33_s30 }
  0x1a   :  { %p568_p11 = scmp.ne.s32.totalorder %s33_s30, %s567_s12  ;;  %p573_p13 = scmp.lt.s32.totalorder %s567_s12, %s567_s12 }
  0x1c   :  { %p574_p0 = por %p573_p13, %p572_p12 }
  0x1e   :  { %p575_p1 = pnand %p574_p0, %p568_p11 }
  0x20   :  { %578 = shalt.err (!%p575_p1)
}
  0x21   :  { %38 = dma.hbm_to_vmem [thread:$0]  %s651_s3, 1024, %s33_s30, [#allocation5], %s584_s25, %s584_s25, %s585_s26  }
  0x22   :  { %579 = dma.done.wait [#allocation3], 2048  }
  0x23   :  { %580 = vsyncadd [#allocation3], 4294965248 }
  0x24   :  { %581 = dma.done.wait [#allocation5], 1024  }
  0x25   :  { %582 = vsyncadd [#allocation5], 4294966272  ;;  %v587_v0 = vmov 0   ;;  %v48_v1 = vld [vmem:[%s649_s1] sm:$0xff]  ;;  %vm63_vm0 = vcmask 1043456   ;;  %vm59_vm1 = vcmask 64512  }
  0x26   :  { %102 = vmatprep.mubr.bf16.mxu0 %v587_v0  ;;  %v414_v2 = vcombine.high %v48_v1, %v48_v1  ;;  %v413_v3 = vcombine.low %v48_v1, %v48_v1  ;;  %v510_v4 = vld [vmem:[%s648_s0] sm:$0xff]   ;;  %v513_v8 = vld [vmem:[#allocation2 + $0x48] sm:$0xff]   ;;  %v515_v10 = vld [vmem:[#allocation2 + $0x50] sm:$0xff]   ;;  %v588_v23 = vmov 0.0   ;;  %vm589_vm2 = vmmov 0  }
  0x27   :  { %v511_v5 = vld [vmem:[#allocation2 + $0x40] sm:$0xff]   ;;  %v514_v9 = vld [vmem:[#allocation2 + $0x8] sm:$0xff]   ;;  %v516_v11 = vld [vmem:[#allocation2 + $0x10] sm:$0xff]  }
  0x28   :  { %415 = vmatprep.subr.msk.bf16.mxu0 %vm63_vm0, %v414_v2  ;;  %v65_v6 = vsel %vm63_vm0, %v413_v3, 0  ;;  %v512_v7 = vld [vmem:[#allocation2] sm:$0xff]   ;;  %450 = vmatprep.subr.bf16.mxu1 %v511_v5  ;;  %v517_v12 = vld [vmem:[#allocation2 + $0x58] sm:$0xff]   ;;  %v521_v16 = vld [vmem:[#allocation2 + $0x68] sm:$0xff]  }
  0x29   :  { %71 = vmatpush1.bf16.msra.mxu0 %v65_v6  ;;  %451 = vmatpush3.bf16.msra.mxu1 %v512_v7  ;;  %v518_v13 = vld [vmem:[#allocation2 + $0x18] sm:$0xff]   ;;  %v519_v14 = vld [vmem:[#allocation2 + $0x60] sm:$0xff]   ;;  %v522_v17 = vld [vmem:[#allocation2 + $0x28] sm:$0xff]  }
  0x2a   :  { %452 = vmatprep.subr.bf16.mxu1 %v513_v8  ;;  %v520_v15 = vld [vmem:[#allocation2 + $0x20] sm:$0xff]   ;;  %v523_v18 = vld [vmem:[#allocation2 + $0x70] sm:$0xff]   ;;  %v525_v20 = vld [vmem:[#allocation2 + $0x78] sm:$0xff]   ;;  %481 = vmatprep.subr.bf16.mxu0 %v588_v23 }
  0x2b   :  { %v524_v19 = vld [vmem:[#allocation2 + $0x30] sm:$0xff]   ;;  %v526_v21 = vld [vmem:[#allocation2 + $0x38] sm:$0xff]   ;;  %v527_v22 = vld [vmem:[#allocation4] sm:$0xff]  }
  0x2c   :  { %416 = vmatmul.mubr.msk.bf16.vlgmr.msra.gmra.mrb[0].mxu0 %vm59_vm1, %v510_v4  ;;  %v528_v24 = vld [vmem:[#allocation4 + $0x8] sm:$0xff]   ;;  %v529_v25 = vld [vmem:[#allocation4 + $0x10] sm:$0xff]   ;;  %v530_v26 = vld [vmem:[#allocation4 + $0x18] sm:$0xff]  }
  0x2d   :  { %453 = vmatpush3.bf16.msra.mxu1 %v514_v9  ;;  %482 = vmatpush3.bf16.msra.mxu0 %v527_v22  ;;  %v531_v27 = vld [vmem:[#allocation4 + $0x20] sm:$0xff]   ;;  %v532_v28 = vld [vmem:[#allocation4 + $0x28] sm:$0xff]   ;;  %v533_v39 = vld [vmem:[#allocation4 + $0x30] sm:$0xff]  }
  0x2e   :  { %454 = vmatprep.subr.bf16.mxu1 %v515_v10  ;;  %483 = vmatprep.subr.bf16.mxu0 %v588_v23  ;;  %v534_v40 = vld [vmem:[#allocation4 + $0x38] sm:$0xff]  }
  0x2f   :  { %497 = vmatprep.mubr.msk.bf16.mxu0 %vm589_vm2, %v588_v23 }
  0x31   :  { %455 = vmatpush3.bf16.msra.mxu1 %v516_v11  ;;  %484 = vmatpush3.bf16.msra.mxu0 %v528_v24 }
  0x32   :  { %456 = vmatprep.subr.bf16.mxu1 %v517_v12  ;;  %485 = vmatprep.subr.bf16.mxu0 %v588_v23 }
  0x35   :  { %457 = vmatpush3.bf16.msra.mxu1 %v518_v13  ;;  %486 = vmatpush3.bf16.msra.mxu0 %v529_v25 }
  0x36   :  { %458 = vmatprep.subr.bf16.mxu1 %v519_v14  ;;  %487 = vmatprep.subr.bf16.mxu0 %v588_v23 }
  0x39   :  { %459 = vmatpush3.bf16.msra.mxu1 %v520_v15  ;;  %488 = vmatpush3.bf16.msra.mxu0 %v530_v26 }
  0x3a   :  { %460 = vmatprep.subr.bf16.mxu1 %v521_v16  ;;  %489 = vmatprep.subr.bf16.mxu0 %v588_v23 }
  0x3d   :  { %461 = vmatpush3.bf16.msra.mxu1 %v522_v17  ;;  %490 = vmatpush3.bf16.msra.mxu0 %v531_v27 }
  0x3e   :  { %462 = vmatprep.subr.bf16.mxu1 %v523_v18  ;;  %491 = vmatprep.subr.bf16.mxu0 %v588_v23 }
  0x41   :  { %463 = vmatpush3.bf16.msra.mxu1 %v524_v19  ;;  %492 = vmatpush3.bf16.msra.mxu0 %v532_v28 }
  0x42   :  { %464 = vmatprep.subr.bf16.mxu1 %v525_v20  ;;  %493 = vmatprep.subr.bf16.mxu0 %v588_v23 }
  0x45   :  { %465 = vmatpush3.bf16.msra.mxu1 %v526_v21  ;;  %494 = vmatpush3.bf16.msra.mxu0 %v533_v39 }
  0x46   :  { %495 = vmatprep.subr.bf16.mxu0 %v588_v23 }
  0x49   :  { %496 = vmatpush3.bf16.msra.mxu0 %v534_v40 }
  0xff   :  { %v104_v29 = vpop.f32.mrb[0].mxu0 }
 0x100   :  { %v106_v30 = vpop.f32.mrb[1].mxu0  ;;  %v113_v32 = vmax.f32 %v104_v29, 0.0 }
 0x101   :  { %v108_v31 = vpop.f32.mrb[2].mxu0  ;;  %v114_v35 = vmax.f32 %v106_v30, 0.0 }
 0x102   :  { %v115_v33 = vmax.f32 %v108_v31, 0.0  ;;  %v110_v34 = vpop.f32.mrb[3].mxu0 }
 0x103   :  { %v116_v36 = vmax.f32 %v110_v34, 0.0 }
 0x104   :  { %v117_v37 = vpack.c.bf16 %v115_v33, %v113_v32 }
 0x105   :  { %v118_v38 = vpack.c.bf16 %v116_v36, %v114_v35 }
 0x107   :  { %279 = vmatprep.mubr.bf16.mxu1 %v118_v38 }
 0x108   :  { %280 = vmatmul.mubr.bf16.vlgmr.msra.gmra.mrb[0].mxu1 %v117_v37 }
 0x1db   :  { %v466_v41 = vpop.f32.mrb[0].mxu1 }
 0x1dc   :  { %v467_v42 = vpop.f32.mrb[1].mxu1 }
 0x1dd   :  { %v468_v43 = vadd.f32 %v467_v42, %v466_v41  ;;  %v469_v44 = vpop.f32.mrb[2].mxu1 }
 0x1de   :  { %v470_v45 = vpop.f32.mrb[3].mxu1 }
 0x1df   :  { %v471_v46 = vadd.f32 %v470_v45, %v469_v44  ;;  %v288_v47 = vmax.f32 %v468_v43, 0.0 }
 0x1e1   :  { %v289_v48 = vmax.f32 %v471_v46, 0.0 }
 0x1e3   :  { %v290_v49 = vpack.c.bf16 %v289_v48, %v288_v47 }
 0x1e5   :  { %498 = vmatmul.mubr.bf16.vlgmr.msra.gmra.mrb[4].mxu0 %v290_v49 }
 0x2b8   :  { %v389_v50 = vpop.f32.mrb[4].mxu0 }
 0x2b9   :  { %v499_v51 = vpop.f32.mrb[5].mxu0 }
 0x2ba   :  { %v392_v52 = vpop.f32.mrb[6].mxu0 }
 0x2bb   :  { %v448_v53 = vpack.c.bf16 %v392_v52, %v389_v50  ;;  %v500_v54 = vpop.f32.mrb[7].mxu0 }
 0x2bd   :  { %449 = vst [vmem:[%s652_s4] sm:$0xff] %v448_v53  }
 0x2be   :  { %410 = vsyncpa [#allocation3], 1 }
 0x2bf   :  { %411 = vsyncpa [#allocation5], 1 }

</bundles_post_ra>
